<compile_context>
chip_gen: v5e
topology: v5e:2x2
jax: 0.10.0
libtpu: 0.0.40
codegen_flags: <defaults>
</compile_context>

<pallas_src>
import jax
import jax.numpy as jnp
from jax.experimental import pallas as pl
from jax.experimental.pallas import tpu as pltpu


def _round_up(n, m):
    return ((n + m - 1) // m) * m


def _mlp_kernel(pair_ref,
                w1_ref, b1_ref,
                w2_ref, b2_ref,
                w3_ref, b3_ref,
                w4t_ref, b4t_ref,
                out_ref):
    cdt = w1_ref.dtype  # compute (MXU input) dtype: bf16 or f32
    # Layer 1: [tile_e, D] @ [D, 256] + b1, ReLU   (f32 accumulation)
    h = jnp.dot(pair_ref[...], w1_ref[...], preferred_element_type=jnp.float32)
    h = jnp.maximum(h + b1_ref[...], 0.0)
    # Layer 2: [tile_e, 256] @ [256, 128] + b2, ReLU
    h = jnp.dot(h.astype(cdt), w2_ref[...], preferred_element_type=jnp.float32)
    h = jnp.maximum(h + b2_ref[...], 0.0)
    # Layer 3: [tile_e, 128] @ [128, 128(pad of 64)] + b3, ReLU
    h = jnp.dot(h.astype(cdt), w3_ref[...], preferred_element_type=jnp.float32)
    h = jnp.maximum(h + b3_ref[...], 0.0)
    # Layer 4, computed transposed so the (large) edge axis stays on lanes:
    #   out^T[c, e] = sum_k w4t[c, k] * h[e, k]      -> [out_pad, tile_e]
    logits_t = jax.lax.dot_general(
        w4t_ref[...], h.astype(cdt),
        dimension_numbers=(((1,), (1,)), ((), ())),
        preferred_element_type=jnp.float32)
    out_ref[...] = logits_t + b4t_ref[...]          # b4t broadcasts over lanes


def multiclass_forward(x, edge_index, edge_features, params, *,
                       tile_e=2048, compute_dtype=jnp.bfloat16):
    """Pallas implementation of MultiClass.forward -> [E, output_class]."""
    v = edge_index[0, :]
    u = edge_index[1, :]
    node_dim = x.shape[1]
    edge_dim = edge_features.shape[1]
    E = edge_features.shape[0]
    D = 2 * node_dim + edge_dim

    (w1, b1), (w2, b2), (w3, b3), (w4, b4) = params
    out_c = w4.shape[1]
    out_pad = _round_up(max(out_c, 1), 8)       # sublane axis of transposed logits
    hid3 = _round_up(w3.shape[1], 128)          # lane-pad the 64-wide hidden layer

    cdt = compute_dtype

    # --- Tile selection: edge axis is the lane axis of the output. ----------
    tile_e = max(128, (int(tile_e) // 128) * 128)
    E_pad = _round_up(E, 128)
    n_steps = -(-E_pad // tile_e)
    if n_steps == 1 and E_pad >= 256:
        n_steps = 2                             # keep >=2 steps for v7x megacore
    tile_e = _round_up(-(-E_pad // n_steps), 128)
    E_pad = tile_e * n_steps

    # --- Build `pair` once, directly in the compute dtype, zero-padded. -----
    xc = x.astype(cdt)
    pair = jnp.concatenate([xc[v], xc[u], edge_features.astype(cdt)], axis=-1)
    if E_pad != E:
        pair = jnp.zeros((E_pad, D), cdt).at[:E, :].set(pair)

    # --- Weight prep: lane-pad hidden-3, build transposed/padded layer 4. ---
    w3p = jnp.zeros((w3.shape[0], hid3), w3.dtype).at[:, :w3.shape[1]].set(w3)
    b3p = jnp.zeros((1, hid3), b3.dtype).at[:, :w3.shape[1]].set(b3)
    w4p = jnp.zeros((hid3, out_pad), w4.dtype).at[:w4.shape[0], :out_c].set(w4)
    w4t = w4p.T                                  # [out_pad, hid3]
    b4t = jnp.zeros((out_pad, 1), jnp.float32).at[:out_c, 0].set(b4[0])

    w1c, w2c, w3c, w4tc = (w.astype(cdt) for w in (w1, w2, w3p, w4t))
    # Biases stay f32: they are added to the f32 accumulator.
    b1f, b2f, b3f = (b.astype(jnp.float32) for b in (b1, b2, b3p))

    full = lambda i: (0, 0)   # weights/biases: whole array, resident across grid

    out = pl.pallas_call(
        _mlp_kernel,
        out_shape=jax.ShapeDtypeStruct((out_pad, E_pad), jnp.float32),
        grid_spec=pltpu.PrefetchScalarGridSpec(
            num_scalar_prefetch=0,
            grid=(E_pad // tile_e,),
            in_specs=[
                pl.BlockSpec((tile_e, D), lambda i: (i, 0)),    # pair embeddings
                pl.BlockSpec(w1c.shape, full), pl.BlockSpec(b1f.shape, full),
                pl.BlockSpec(w2c.shape, full), pl.BlockSpec(b2f.shape, full),
                pl.BlockSpec(w3c.shape, full), pl.BlockSpec(b3f.shape, full),
                pl.BlockSpec(w4tc.shape, full), pl.BlockSpec(b4t.shape, full),
            ],
            out_specs=pl.BlockSpec((out_pad, tile_e), lambda i: (0, i)),
        ),
        compiler_params=pltpu.CompilerParams(
            dimension_semantics=("parallel",)),
    )(pair, w1c, b1f, w2c, b2f, w3c, b3f, w4tc, b4t)

    # Strip logit-row padding and edge padding; return [E, out_c].
    return out[:out_c, :E].T


def init_mlp_params(key, node_dim, edge_dim, output_class):
    """Deterministic PyTorch-style (uniform +-1/sqrt(fan_in)) Linear init."""
    d_in = 2 * node_dim + edge_dim
    dims = [d_in, 256, 128, 64, output_class]
    params = []
    for i in range(4):
        key, kw, kb = jax.random.split(key, 3)
        bound = 1.0 / jnp.sqrt(dims[i])
        w = jax.random.uniform(kw, (dims[i], dims[i + 1]),
                               minval=-bound, maxval=bound, dtype=jnp.float32)
        b = jax.random.uniform(kb, (1, dims[i + 1]),
                               minval=-bound, maxval=bound, dtype=jnp.float32)
        params.append((w, b))
    return params


def reference_forward(x, edge_index, edge_features, params):
    """Pure-JAX reference (HIGHEST matmul precision) for correctness checking."""
    v = edge_index[0, :]
    u = edge_index[1, :]
    h = jnp.concatenate([x[v], x[u], edge_features], axis=-1).astype(jnp.float32)
    for i, (w, b) in enumerate(params):
        h = jnp.dot(h, w, precision=jax.lax.Precision.HIGHEST) + b
        if i < 3:
            h = jnp.maximum(h, 0.0)
    return h


if __name__ == "__main__":
    # Small synthetic shapes consistent with the module's forward().
    node_dim = 16
    edge_dim = 8
    output_class = 3
    num_nodes = 32

    key = jax.random.PRNGKey(0)
    k_x, k_p, k_e = jax.random.split(key, 3)

    x = jax.random.normal(k_x, (num_nodes, node_dim), dtype=jnp.float32)
    params = init_mlp_params(k_p, node_dim, edge_dim, output_class)

    # Two edge counts: 64 (single 128-lane tile, exercises padding) and
    # 300 (spans 2 tiles, exercises the multi-step "parallel" grid axis).
    for num_edges in (64, 300):
        k_e, k_ei, k_ef = jax.random.split(k_e, 3)
        edge_index = jax.random.randint(k_ei, (2, num_edges), 0, num_nodes,
                                        dtype=jnp.int32)
        edge_features = jax.random.normal(k_ef, (num_edges, edge_dim),
                                          dtype=jnp.float32)

        ref = reference_forward(x, edge_index, edge_features, params)

        # f32 compute path (tolerance covers TPU default-vs-highest matmul
        # precision differences; structural bugs would be O(0.1-1) off).
        out_f32 = jax.block_until_ready(
            multiclass_forward(x, edge_index, edge_features, params,
                               compute_dtype=jnp.float32))
        assert out_f32.shape == (num_edges, output_class)
        assert jnp.allclose(out_f32, ref, atol=2e-2, rtol=2e-2)

        # bf16 fast path (bf16 MXU inputs, f32 accumulation) — relaxed tolerance.
        out_bf16 = jax.block_until_ready(
            multiclass_forward(x, edge_index, edge_features, params,
                               compute_dtype=jnp.bfloat16))
        assert out_bf16.shape == (num_edges, output_class)
        assert jnp.allclose(out_bf16, ref, atol=5e-2, rtol=5e-2)

    print("KERNEL_OK")
</pallas_src>

<mosaic_0001>
module attributes {stable_mosaic.version = 11 : i64} {
  func.func @_mlp_kernel(%arg0: i32, %arg1: memref<128x40xf32, #tpu.memory_space<vmem>>, %arg2: memref<40x256xf32, #tpu.memory_space<vmem>>, %arg3: memref<1x256xf32, #tpu.memory_space<vmem>>, %arg4: memref<256x128xf32, #tpu.memory_space<vmem>>, %arg5: memref<1x128xf32, #tpu.memory_space<vmem>>, %arg6: memref<128x128xf32, #tpu.memory_space<vmem>>, %arg7: memref<1x128xf32, #tpu.memory_space<vmem>>, %arg8: memref<8x128xf32, #tpu.memory_space<vmem>>, %arg9: memref<8x1xf32, #tpu.memory_space<vmem>>, %arg10: memref<8x128xf32, #tpu.memory_space<vmem>>) attributes {dimension_semantics = [#tpu.dimension_semantics<parallel>], iteration_bounds = array<i64: 1>, scalar_prefetch = 0 : i64, scratch_operands = 0 : i64, tpu.core_type = #tpu.core_type<tc>, window_params = [{transform_indices = @transform_0, window_bounds = array<i64: 128, 40>}, {pipeline_mode = #tpu.pipeline_mode<synchronous>, transform_indices = @transform_1, window_bounds = array<i64: 40, 256>}, {pipeline_mode = #tpu.pipeline_mode<synchronous>, transform_indices = @transform_2, window_bounds = array<i64: 1, 256>}, {pipeline_mode = #tpu.pipeline_mode<synchronous>, transform_indices = @transform_3, window_bounds = array<i64: 256, 128>}, {pipeline_mode = #tpu.pipeline_mode<synchronous>, transform_indices = @transform_4, window_bounds = array<i64: 1, 128>}, {pipeline_mode = #tpu.pipeline_mode<synchronous>, transform_indices = @transform_5, window_bounds = array<i64: 128, 128>}, {pipeline_mode = #tpu.pipeline_mode<synchronous>, transform_indices = @transform_6, window_bounds = array<i64: 1, 128>}, {pipeline_mode = #tpu.pipeline_mode<synchronous>, transform_indices = @transform_7, window_bounds = array<i64: 8, 128>}, {pipeline_mode = #tpu.pipeline_mode<synchronous>, transform_indices = @transform_8, window_bounds = array<i64: 8, 1>}, {transform_indices = @transform_9, window_bounds = array<i64: 8, 128>}]} {
    %c0 = arith.constant 0 : index
    %c0_0 = arith.constant 0 : index
    %0 = vector.load %arg1[%c0, %c0_0] : memref<128x40xf32, #tpu.memory_space<vmem>>, vector<128x40xf32>
    %c0_1 = arith.constant 0 : index
    %c0_2 = arith.constant 0 : index
    %1 = vector.load %arg2[%c0_1, %c0_2] : memref<40x256xf32, #tpu.memory_space<vmem>>, vector<40x256xf32>
    %cst = arith.constant dense<0.000000e+00> : vector<128x256xf32>
    %2 = tpu.matmul %0, %1, %cst {dimension_numbers = #tpu.dot_dimension_numbers<[1], [0], [0], [1], [0, 0, 1, 1], [], []>} : vector<128x40xf32>, vector<40x256xf32>, vector<128x256xf32> -> vector<128x256xf32>
    %c0_3 = arith.constant 0 : index
    %c0_4 = arith.constant 0 : index
    %3 = vector.load %arg3[%c0_3, %c0_4] : memref<1x256xf32, #tpu.memory_space<vmem>>, vector<1x256xf32>
    %4 = vector.broadcast %3 : vector<1x256xf32> to vector<128x256xf32>
    %5 = arith.addf %2, %4 : vector<128x256xf32>
    %cst_5 = arith.constant 0.000000e+00 : f32
    %6 = vector.broadcast %cst_5 : f32 to vector<128x256xf32>
    %7 = arith.maximumf %5, %6 : vector<128x256xf32>
    %c0_6 = arith.constant 0 : index
    %c0_7 = arith.constant 0 : index
    %8 = vector.load %arg4[%c0_6, %c0_7] : memref<256x128xf32, #tpu.memory_space<vmem>>, vector<256x128xf32>
    %cst_8 = arith.constant dense<0.000000e+00> : vector<128x128xf32>
    %9 = tpu.matmul %7, %8, %cst_8 {dimension_numbers = #tpu.dot_dimension_numbers<[1], [0], [0], [1], [0, 0, 1, 1], [], []>} : vector<128x256xf32>, vector<256x128xf32>, vector<128x128xf32> -> vector<128x128xf32>
    %c0_9 = arith.constant 0 : index
    %c0_10 = arith.constant 0 : index
    %10 = vector.load %arg5[%c0_9, %c0_10] : memref<1x128xf32, #tpu.memory_space<vmem>>, vector<1x128xf32>
    %11 = vector.broadcast %10 : vector<1x128xf32> to vector<128x128xf32>
    %12 = arith.addf %9, %11 : vector<128x128xf32>
    %cst_11 = arith.constant 0.000000e+00 : f32
    %13 = vector.broadcast %cst_11 : f32 to vector<128x128xf32>
    %14 = arith.maximumf %12, %13 : vector<128x128xf32>
    %c0_12 = arith.constant 0 : index
    %c0_13 = arith.constant 0 : index
    %15 = vector.load %arg6[%c0_12, %c0_13] : memref<128x128xf32, #tpu.memory_space<vmem>>, vector<128x128xf32>
    %cst_14 = arith.constant dense<0.000000e+00> : vector<128x128xf32>
    %16 = tpu.matmul %14, %15, %cst_14 {dimension_numbers = #tpu.dot_dimension_numbers<[1], [0], [0], [1], [0, 0, 1, 1], [], []>} : vector<128x128xf32>, vector<128x128xf32>, vector<128x128xf32> -> vector<128x128xf32>
    %c0_15 = arith.constant 0 : index
    %c0_16 = arith.constant 0 : index
    %17 = vector.load %arg7[%c0_15, %c0_16] : memref<1x128xf32, #tpu.memory_space<vmem>>, vector<1x128xf32>
    %18 = vector.broadcast %17 : vector<1x128xf32> to vector<128x128xf32>
    %19 = arith.addf %16, %18 : vector<128x128xf32>
    %cst_17 = arith.constant 0.000000e+00 : f32
    %20 = vector.broadcast %cst_17 : f32 to vector<128x128xf32>
    %21 = arith.maximumf %19, %20 : vector<128x128xf32>
    %c0_18 = arith.constant 0 : index
    %c0_19 = arith.constant 0 : index
    %22 = vector.load %arg8[%c0_18, %c0_19] : memref<8x128xf32, #tpu.memory_space<vmem>>, vector<8x128xf32>
    %cst_20 = arith.constant dense<0.000000e+00> : vector<8x128xf32>
    %23 = tpu.matmul %22, %21, %cst_20 {dimension_numbers = #tpu.dot_dimension_numbers<[1], [1], [0], [0], [0, 0, 1, 0], [], []>} : vector<8x128xf32>, vector<128x128xf32>, vector<8x128xf32> -> vector<8x128xf32>
    %c0_21 = arith.constant 0 : index
    %c0_22 = arith.constant 0 : index
    %24 = vector.load %arg9[%c0_21, %c0_22] : memref<8x1xf32, #tpu.memory_space<vmem>>, vector<8x1xf32>
    %25 = vector.broadcast %24 : vector<8x1xf32> to vector<8x128xf32>
    %26 = arith.addf %23, %25 : vector<8x128xf32>
    %c0_23 = arith.constant 0 : index
    %c0_24 = arith.constant 0 : index
    %27 = vector.load %arg10[%c0_23, %c0_24] : memref<8x128xf32, #tpu.memory_space<vmem>>, vector<8x128xf32>
    tpu.vector_store %arg10[%c0_23, %c0_24], %26 {strides = array<i32>} : memref<8x128xf32, #tpu.memory_space<vmem>>, vector<8x128xf32>,
    return
  }
  func.func @transform_0(%arg0: i32) -> (i32, i32) {
    %c0_i32 = arith.constant 0 : i32
    %c0_i32_0 = arith.constant 0 : i32
    return %arg0, %c0_i32 : i32, i32
  }
  func.func @transform_1(%arg0: i32) -> (i32, i32) {
    %c0_i32 = arith.constant 0 : i32
    %c0_i32_0 = arith.constant 0 : i32
    %c0_i32_1 = arith.constant 0 : i32
    return %c0_i32, %c0_i32_0 : i32, i32
  }
  func.func @transform_2(%arg0: i32) -> (i32, i32) {
    %c0_i32 = arith.constant 0 : i32
    %c0_i32_0 = arith.constant 0 : i32
    %c0_i32_1 = arith.constant 0 : i32
    return %c0_i32, %c0_i32_0 : i32, i32
  }
  func.func @transform_3(%arg0: i32) -> (i32, i32) {
    %c0_i32 = arith.constant 0 : i32
    %c0_i32_0 = arith.constant 0 : i32
    %c0_i32_1 = arith.constant 0 : i32
    return %c0_i32, %c0_i32_0 : i32, i32
  }
  func.func @transform_4(%arg0: i32) -> (i32, i32) {
    %c0_i32 = arith.constant 0 : i32
    %c0_i32_0 = arith.constant 0 : i32
    %c0_i32_1 = arith.constant 0 : i32
    return %c0_i32, %c0_i32_0 : i32, i32
  }
  func.func @transform_5(%arg0: i32) -> (i32, i32) {
    %c0_i32 = arith.constant 0 : i32
    %c0_i32_0 = arith.constant 0 : i32
    %c0_i32_1 = arith.constant 0 : i32
    return %c0_i32, %c0_i32_0 : i32, i32
  }
  func.func @transform_6(%arg0: i32) -> (i32, i32) {
    %c0_i32 = arith.constant 0 : i32
    %c0_i32_0 = arith.constant 0 : i32
    %c0_i32_1 = arith.constant 0 : i32
    return %c0_i32, %c0_i32_0 : i32, i32
  }
  func.func @transform_7(%arg0: i32) -> (i32, i32) {
    %c0_i32 = arith.constant 0 : i32
    %c0_i32_0 = arith.constant 0 : i32
    %c0_i32_1 = arith.constant 0 : i32
    return %c0_i32, %c0_i32_0 : i32, i32
  }
  func.func @transform_8(%arg0: i32) -> (i32, i32) {
    %c0_i32 = arith.constant 0 : i32
    %c0_i32_0 = arith.constant 0 : i32
    %c0_i32_1 = arith.constant 0 : i32
    return %c0_i32, %c0_i32_0 : i32, i32
  }
  func.func @transform_9(%arg0: i32) -> (i32, i32) {
    %c0_i32 = arith.constant 0 : i32
    %c0_i32_0 = arith.constant 0 : i32
    return %c0_i32, %arg0 : i32, i32
  }
}

</mosaic_0001>

<bundles_post_ra>
// kernel: tpu_custom_call.1
= control target key start
LH: loop header
LB: loop body
LE: loop exit
PB: predicated region body
PF: predicated region fallthrough
CT: control target
= control target key end

     0   :  { %14 = vsyncpa [#allocation3], 0  ;;  %s1052_s0 = inlined_call_operand.vmem [shape: f32[128,40], index: 0, kind: input, shape index: {}]   ;;  %s1053_s1 = inlined_call_operand.hbm [shape: f32[40,256], index: 1, kind: input, shape index: {}]   ;;  %s1054_s2 = inlined_call_operand.vmem [shape: f32[1,256], index: 2, kind: input, shape index: {}]   ;;  %s1055_s3 = inlined_call_operand.hbm [shape: f32[256,128], index: 3, kind: input, shape index: {}]   ;;  %s1056_s4 = inlined_call_operand.vmem [shape: f32[1,128], index: 4, kind: input, shape index: {}]   ;;  %s1057_s5 = inlined_call_operand.vmem [shape: f32[128,128], index: 5, kind: input, shape index: {}]   ;;  %s1058_s6 = inlined_call_operand.vmem [shape: f32[1,128], index: 6, kind: input, shape index: {}]   ;;  %s1059_s7 = inlined_call_operand.vmem [shape: f32[8,128], index: 7, kind: input, shape index: {}]   ;;  %s1060_s8 = inlined_call_operand.vmem [shape: f32[8,1], index: 8, kind: input, shape index: {}]   ;;  %s1061_s9 = inlined_call_operand.hbm [shape: f32[8,128], index: 9, kind: output, shape index: {}]  }
   0x1   :  { %15 = vsyncpa [#allocation6], 0 }
   0x2   :  { %16 = vsyncpa [#allocation4], 0  ;;  %s23_s11 = sshll.u32 %s1053_s1, 4  ;;  %s773_s12 = smov [#allocation2]   ;;  %s24_s11 = int_to_ptr.hbm [resolvable:$true] %s23_s11 }
   0x3   :  { %s25_s13 = sshll.u32 %s773_s12, 4  ;;  %s38_s16 = sshll.u32 %s1055_s3, 4  ;;  %s26_s13 = int_to_ptr.vmem [resolvable:$true] %s25_s13  ;;  %s39_s16 = int_to_ptr.hbm [resolvable:$true] %s38_s16 }
   0x4   :  { %s774_s17 = smov 256   ;;  %s775_s18 = smov 16  }
   0x5   :  { %31 = dma.hbm_to_vmem [thread:$0]  %s24_s11, 1280, %s26_s13, [#allocation3], %s774_s17, %s774_s17, %s775_s18  }
   0x6   :  { %s776_s19 = smov [#allocation5]   ;;  %s777_s21 = smov 128  }
   0x7   :  { %s40_s20 = sshll.u32 %s776_s19, 4  ;;  %s778_s22 = smov 8   ;;  %s41_s20 = int_to_ptr.vmem [resolvable:$true] %s40_s20 }
   0x8   :  { %46 = dma.hbm_to_vmem [thread:$0]  %s39_s16, 4096, %s41_s20, [#allocation6], %s777_s21, %s777_s21, %s778_s22  }
   0x9   :  { %767 = dma.done.wait [#allocation3], 1280  }
   0xa   :  { %768 = vsyncadd [#allocation3], 4294966016 }
   0xb   :  { %769 = dma.done.wait [#allocation6], 4096  }
   0xc   :  { %770 = vsyncadd [#allocation6], 4294963200  ;;  %v89_v0 = vld [vmem:[#allocation2 + $0x40] sm:$0xff]  ;;  %v87_v1 = vld [vmem:[#allocation2 + $0x30] sm:$0xff]  ;;  %vm97_vm0 = vcmask 326656   ;;  %s780_s20 = smov [#allocation7]  }
   0xd   :  { %157 = vmatpush.msra.mxu0 %v89_v0  ;;  %669 = vmatpush.msra.mxu1 %v89_v0  ;;  %v85_v2 = vld [vmem:[#allocation2 + $0x20] sm:$0xff]  ;;  %v83_v3 = vld [vmem:[#allocation2 + $0x10] sm:$0xff]  ;;  %v90_v7 = vld [vmem:[#allocation2 + $0x48] sm:$0xff]  ;;  %s624_s21 = sshll.u32 %s780_s20, 4  ;;  %s626_s3 = sshll.u32 %s1061_s9, 4  ;;  %s625_s21 = int_to_ptr.vmem [resolvable:$true] %s624_s21  ;;  %s627_s3 = int_to_ptr.hbm [resolvable:$true] %s626_s3 }
   0xe   :  { %670 = vmatpush.msra.mxu2 %v89_v0  ;;  %671 = vmatpush.msra.mxu3 %v89_v0  ;;  %v81_v4 = vld [vmem:[#allocation2] sm:$0xff]  ;;  %v88_v8 = vld [vmem:[#allocation2 + $0x38] sm:$0xff]  ;;  %v86_v9 = vld [vmem:[#allocation2 + $0x28] sm:$0xff] }
   0xf   :  { %158 = vmatpush.msra.mxu0 %v87_v1  ;;  %672 = vmatpush.msra.mxu1 %v87_v1  ;;  %v65_v5 = vld [vmem:[%s1052_s0] sm:$0xff]  ;;  %v84_v10 = vld [vmem:[#allocation2 + $0x18] sm:$0xff]  ;;  %v66_v11 = vld [vmem:[%s1052_s0 + $0x8] sm:$0xff] }
  0x10   :  { %673 = vmatpush.msra.mxu2 %v87_v1  ;;  %674 = vmatpush.msra.mxu3 %v87_v1  ;;  %v69_v6 = vld [vmem:[%s1052_s0 + $0x20] sm:$0xff]  ;;  %v70_v12 = vld [vmem:[%s1052_s0 + $0x28] sm:$0xff]  ;;  %v67_v14 = vld [vmem:[%s1052_s0 + $0x10] sm:$0xff] }
  0x11   :  { %159 = vmatpush.msra.mxu0 %v85_v2  ;;  %675 = vmatpush.msra.mxu1 %v85_v2  ;;  %v82_v13 = vld [vmem:[#allocation2 + $0x8] sm:$0xff]  ;;  %v71_v15 = vld [vmem:[%s1052_s0 + $0x30] sm:$0xff]  ;;  %v68_v16 = vld [vmem:[%s1052_s0 + $0x18] sm:$0xff] }
  0x12   :  { %676 = vmatpush.msra.mxu2 %v85_v2  ;;  %677 = vmatpush.msra.mxu3 %v85_v2  ;;  %v72_v17 = vld [vmem:[%s1052_s0 + $0x38] sm:$0xff]  ;;  %v73_v18 = vld [vmem:[%s1052_s0 + $0x40] sm:$0xff]  ;;  %v74_v19 = vld [vmem:[%s1052_s0 + $0x48] sm:$0xff] }
  0x13   :  { %160 = vmatpush.msra.mxu0 %v83_v3  ;;  %678 = vmatpush.msra.mxu1 %v83_v3  ;;  %v75_v20 = vld [vmem:[%s1052_s0 + $0x50] sm:$0xff]  ;;  %v323_v21 = vld [vmem:[#allocation5 + $0x78] sm:$0xff]  ;;  %v322_v22 = vld [vmem:[#allocation5 + $0x70] sm:$0xff] }
  0x14   :  { %679 = vmatpush.msra.mxu2 %v83_v3  ;;  %680 = vmatpush.msra.mxu3 %v83_v3  ;;  %v321_v23 = vld [vmem:[#allocation5 + $0x68] sm:$0xff]  ;;  %v320_v24 = vld [vmem:[#allocation5 + $0x60] sm:$0xff]  ;;  %v319_v26 = vld [vmem:[#allocation5 + $0x58] sm:$0xff] }
  0x15   :  { %161 = vmatpush.msra.mxu0 %v81_v4  ;;  %681 = vmatpush.msra.mxu1 %v81_v4  ;;  %v890_v25 = vld [vmem:[%s1052_s0 + $0x58] sm:$0xff]  ;;  %v318_v27 = vld [vmem:[#allocation5 + $0x50] sm:$0xff]  ;;  %v316_v29 = vld [vmem:[#allocation5 + $0x40] sm:$0xff] }
  0x16   :  { %637 = vmatmul.msk.f32.vlgmr.msra.gmra.mxu0 %vm97_vm0, %v65_v5  ;;  %641 = vmatmul.msk.f32.vlgmr.msra.gmra.mxu1 %vm97_vm0, %v69_v6  ;;  %v317_v28 = vld [vmem:[#allocation5 + $0x48] sm:$0xff]  ;;  %v898_v30 = vld [vmem:[%s1052_s0 + $0x60] sm:$0xff]  ;;  %v315_v31 = vld [vmem:[#allocation5 + $0x38] sm:$0xff] }
  0x17   :  { %222 = vmatpush.msrb.mxu1 %v90_v7  ;;  %682 = vmatpush.msra.mxu2 %v81_v4  ;;  %v314_v32 = vld [vmem:[#allocation5 + $0x30] sm:$0xff]  ;;  %v313_v33 = vld [vmem:[#allocation5 + $0x28] sm:$0xff]  ;;  %v312_v34 = vld [vmem:[#allocation5 + $0x20] sm:$0xff] }
  0x18   :  { %683 = vmatpush.msra.mxu3 %v81_v4  ;;  %645 = vmatmul.msk.f32.vlgmr.msra.gmra.mxu2 %vm97_vm0, %v73_v18  ;;  %v906_v35 = vld [vmem:[%s1052_s0 + $0x68] sm:$0xff]  ;;  %v310_v37 = vld [vmem:[#allocation5 + $0x10] sm:$0xff]  ;;  %v309_v38 = vld [vmem:[#allocation5 + $0x8] sm:$0xff] }
  0x19   :  { %223 = vmatpush.msrb.mxu1 %v88_v8  ;;  %344 = vmatpush.msrb.mxu2 %v323_v21  ;;  %v311_v36 = vld [vmem:[#allocation5 + $0x18] sm:$0xff]  ;;  %v308_v39 = vld [vmem:[#allocation5] sm:$0xff]  ;;  %v338_v41 = vld [vmem:[#allocation5 + $0xf0] sm:$0xff] }
  0x1a   :  { %v339_v40 = vld [vmem:[#allocation5 + $0xf8] sm:$0xff]  ;;  %v337_v42 = vld [vmem:[#allocation5 + $0xe8] sm:$0xff]  ;;  %v79_v43 = vld [vmem:[%s1052_s0 + $0x70] sm:$0xff] }
  0x1b   :  { %224 = vmatpush.msrb.mxu1 %v86_v9  ;;  %345 = vmatpush.msrb.mxu2 %v322_v22  ;;  %v336_v44 = vld [vmem:[#allocation5 + $0xe0] sm:$0xff]  ;;  %v335_v45 = vld [vmem:[#allocation5 + $0xd8] sm:$0xff]  ;;  %v334_v46 = vld [vmem:[#allocation5 + $0xd0] sm:$0xff] }
  0x1c   :  { %409 = vmatpush.msrb.mxu3 %v339_v40  ;;  %v333_v47 = vld [vmem:[#allocation5 + $0xc8] sm:$0xff]  ;;  %v332_v49 = vld [vmem:[#allocation5 + $0xc0] sm:$0xff]  ;;  %v331_v50 = vld [vmem:[#allocation5 + $0xb8] sm:$0xff] }
  0x1d   :  { %225 = vmatpush.msrb.mxu1 %v84_v10  ;;  %346 = vmatpush.msrb.mxu2 %v321_v23  ;;  %v80_v48 = vld [vmem:[%s1052_s0 + $0x78] sm:$0xff]  ;;  %v330_v51 = vld [vmem:[#allocation5 + $0xb0] sm:$0xff]  ;;  %v328_v54 = vld [vmem:[#allocation5 + $0xa0] sm:$0xff] }
  0x1e   :  { %638 = vmatmul.msk.f32.gmra.mxu0 %vm97_vm0, %v66_v11  ;;  %642 = vmatmul.msk.f32.gmra.mxu1 %vm97_vm0, %v70_v12  ;;  %v329_v52 = vld [vmem:[#allocation5 + $0xa8] sm:$0xff]  ;;  %v91_v53 = vld [vmem:[%s1054_s2] sm:$0x3]  ;;  %v327_v56 = vld [vmem:[#allocation5 + $0x98] sm:$0xff] }
  0x1f   :  { %226 = vmatpush.msrb.mxu1 %v82_v13  ;;  %347 = vmatpush.msrb.mxu2 %v320_v24  ;;  %v926_v55 = vperm.slane %v91_v53, 0  ;;  %v326_v57 = vld [vmem:[#allocation5 + $0x90] sm:$0xff]  ;;  %v325_v61 = vld [vmem:[#allocation5 + $0x88] sm:$0xff]  ;;  %v324_v63 = vld [vmem:[#allocation5 + $0x80] sm:$0xff] }
  0x20   :  { %646 = vmatmul.msk.f32.gmra.mxu2 %vm97_vm0, %v74_v19  ;;  %410 = vmatpush.msrb.mxu3 %v338_v41 }
  0x21   :  { %348 = vmatpush.msrb.mxu2 %v319_v26  ;;  %651 = vmatmul.msk.f32.vlgmr.msra.gmra.mxu3 %vm97_vm0, %v79_v43 }
  0x22   :  { %411 = vmatpush.msrb.mxu3 %v337_v42 }
  0x23   :  { %349 = vmatpush.msrb.mxu2 %v318_v27 }
  0x24   :  { %412 = vmatpush.msrb.mxu3 %v336_v44 }
  0x25   :  { %350 = vmatpush.msrb.mxu2 %v317_v28 }
  0x26   :  { %639 = vmatmul.msk.f32.gmra.mxu0 %vm97_vm0, %v67_v14  ;;  %643 = vmatmul.msk.f32.gmra.mxu1 %vm97_vm0, %v71_v15 }
  0x27   :  { %351 = vmatpush.msrb.mxu2 %v316_v29  ;;  %413 = vmatpush.msrb.mxu3 %v335_v45 }
  0x28   :  { %647 = vmatmul.msk.f32.gmra.mxu2 %vm97_vm0, %v75_v20 }
  0x29   :  { %352 = vmatpush.msrb.mxu2 %v315_v31  ;;  %414 = vmatpush.msrb.mxu3 %v334_v46 }
  0x2a   :  { %652 = vmatmul.msk.f32.gmra.mxu3 %vm97_vm0, %v80_v48 }
  0x2b   :  { %353 = vmatpush.msrb.mxu2 %v314_v32  ;;  %415 = vmatpush.msrb.mxu3 %v333_v47 }
  0x2d   :  { %354 = vmatpush.msrb.mxu2 %v313_v33  ;;  %416 = vmatpush.msrb.mxu3 %v332_v49 }
  0x2e   :  { %640 = vmatmul.msk.f32.gmra.mxu0 %vm97_vm0, %v68_v16  ;;  %644 = vmatmul.msk.f32.gmra.mxu1 %vm97_vm0, %v72_v17 }
  0x2f   :  { %355 = vmatpush.msrb.mxu2 %v312_v34  ;;  %417 = vmatpush.msrb.mxu3 %v331_v50 }
  0x30   :  { %648 = vmatmul.msk.f32.gmra.mxu2 %vm97_vm0, %v890_v25 }
  0x31   :  { %356 = vmatpush.msrb.mxu2 %v311_v36  ;;  %418 = vmatpush.msrb.mxu3 %v330_v51 }
  0x33   :  { %357 = vmatpush.msrb.mxu2 %v310_v37  ;;  %419 = vmatpush.msrb.mxu3 %v329_v52 }
  0x35   :  { %358 = vmatpush.msrb.mxu2 %v309_v38  ;;  %420 = vmatpush.msrb.mxu3 %v328_v54 }
  0x36   :  { %653 = vmatmul.msk.f32.vlgmr.msrb.gmra.mxu1 %vm97_vm0, %v65_v5 }
  0x37   :  { %359 = vmatpush.msrb.mxu2 %v308_v39  ;;  %421 = vmatpush.msrb.mxu3 %v327_v56 }
  0x38   :  { %649 = vmatmul.msk.f32.gmra.mxu2 %vm97_vm0, %v898_v30 }
  0x39   :  { %422 = vmatpush.msrb.mxu3 %v326_v57 }
  0x3b   :  { %423 = vmatpush.msrb.mxu3 %v325_v61 }
  0x3d   :  { %424 = vmatpush.msrb.mxu3 %v324_v63 }
  0x3e   :  { %654 = vmatmul.msk.f32.gmra.mxu1 %vm97_vm0, %v66_v11 }
  0x40   :  { %650 = vmatmul.msk.f32.gmra.mxu2 %vm97_vm0, %v906_v35 }
  0x46   :  { %655 = vmatmul.msk.f32.gmra.mxu1 %vm97_vm0, %v67_v14 }
  0x4e   :  { %656 = vmatmul.msk.f32.gmra.mxu1 %vm97_vm0, %v68_v16 }
  0x56   :  { %657 = vmatmul.msk.f32.gmra.mxu1 %vm97_vm0, %v69_v6 }
  0x5e   :  { %658 = vmatmul.msk.f32.gmra.mxu1 %vm97_vm0, %v70_v12  ;;  %v938_v12 = vperm.slane %v91_v53, 1 }
  0x66   :  { %659 = vmatmul.msk.f32.gmra.mxu1 %vm97_vm0, %v71_v15 }
  0x6e   :  { %660 = vmatmul.msk.f32.gmra.mxu1 %vm97_vm0, %v72_v17 }
  0x76   :  { %661 = vmatmul.msk.f32.gmra.mxu1 %vm97_vm0, %v73_v18 }
  0x7e   :  { %662 = vmatmul.msk.f32.gmra.mxu1 %vm97_vm0, %v74_v19 }
  0x86   :  { %663 = vmatmul.msk.f32.gmra.mxu1 %vm97_vm0, %v75_v20 }
  0x8e   :  { %664 = vmatmul.msk.f32.gmra.mxu1 %vm97_vm0, %v890_v25 }
  0x93   :  { %v163_v58 = vpop.f32.mrf.mxu0  ;;  %v175_v59 = vpop.f32.mrf.mxu1 }
  0x94   :  { %v164_v60 = vadd.f32 %v163_v58, %v926_v55  ;;  %v176_v13 = vadd.f32 %v175_v59, %v926_v55 }
  0x96   :  { %v276_v62 = vmax.f32 %v164_v60, 0.0  ;;  %665 = vmatmul.msk.f32.gmra.mxu1 %vm97_vm0, %v898_v30  ;;  %v284_v16 = vmax.f32 %v176_v13, 0.0 }
  0x98   :  { %360 = vmatmul.f32.vlgmr.msrb.gmra.mxu2 %v276_v62 }
  0x9b   :  { %v166_v0 = vpop.f32.mrf.mxu0  ;;  %v178_v1 = vpop.f32.mrf.mxu1 }
  0x9c   :  { %v167_v2 = vadd.f32 %v166_v0, %v926_v55  ;;  %v179_v18 = vadd.f32 %v178_v1, %v926_v55  ;;  %v187_v29 = vpop.f32.mrf.mxu2 }
  0x9d   :  { %v188_v34 = vadd.f32 %v187_v29, %v926_v55 }
  0x9e   :  { %v278_v3 = vmax.f32 %v167_v2, 0.0  ;;  %666 = vmatmul.msk.f32.gmra.mxu1 %vm97_vm0, %v906_v35  ;;  %v286_v21 = vmax.f32 %v179_v18, 0.0 }
  0x9f   :  { %v292_v38 = vmax.f32 %v188_v34, 0.0  ;;  %v492_v34 = vld [vmem:[%s1057_s5 + $0x10] sm:$0xff] }
  0xa0   :  { %363 = vmatmul.f32.gmra.mxu2 %v278_v3 }
  0xa3   :  { %v169_v4 = vpop.f32.mrf.mxu0  ;;  %v181_v5 = vpop.f32.mrf.mxu1 }
  0xa4   :  { %v170_v6 = vadd.f32 %v169_v4, %v926_v55  ;;  %v182_v23 = vadd.f32 %v181_v5, %v926_v55  ;;  %v190_v35 = vpop.f32.mrf.mxu2 }
  0xa5   :  { %v191_v40 = vadd.f32 %v190_v35, %v926_v55 }
  0xa6   :  { %v280_v7 = vmax.f32 %v170_v6, 0.0  ;;  %667 = vmatmul.msk.f32.gmra.mxu1 %vm97_vm0, %v79_v43  ;;  %v288_v26 = vmax.f32 %v182_v23, 0.0  ;;  %v505_v6 = vld [vmem:[%s1057_s5 + $0x78] sm:$0xff] }
  0xa7   :  { %v294_v44 = vmax.f32 %v191_v40, 0.0  ;;  %510 = vmatpush.msrb.mxu0 %v505_v6  ;;  %v490_v40 = vld [vmem:[%s1057_s5] sm:$0xff] }
  0xa8   :  { %366 = vmatmul.f32.gmra.mxu2 %v280_v7  ;;  %v205_v7 = vpop.f32.mrf.mxu3 }
  0xab   :  { %v172_v8 = vpop.f32.mrf.mxu0  ;;  %v184_v9 = vpop.f32.mrf.mxu1 }
  0xac   :  { %v173_v10 = vadd.f32 %v172_v8, %v926_v55  ;;  %v185_v28 = vadd.f32 %v184_v9, %v926_v55  ;;  %v193_v41 = vpop.f32.mrf.mxu2  ;;  %v206_v8 = vadd.f32 %v205_v7, %v926_v55  ;;  %v504_v9 = vld [vmem:[%s1057_s5 + $0x70] sm:$0xff] }
  0xad   :  { %v194_v46 = vadd.f32 %v193_v41, %v926_v55  ;;  %511 = vmatpush.msrb.mxu0 %v504_v9 }
  0xae   :  { %v282_v11 = vmax.f32 %v173_v10, 0.0  ;;  %668 = vmatmul.msk.f32.gmra.mxu1 %vm97_vm0, %v80_v48  ;;  %v290_v32 = vmax.f32 %v185_v28, 0.0  ;;  %v304_v13 = vmax.f32 %v206_v8, 0.0 }
  0xaf   :  { %v296_v50 = vmax.f32 %v194_v46, 0.0 }
  0xb0   :  { %369 = vmatmul.f32.gmra.mxu2 %v282_v11  ;;  %v208_v18 = vpop.f32.mrf.mxu3 }
  0xb3   :  { %v228_v14 = vpop.f32.mrf.mxu1 }
  0xb4   :  { %v229_v15 = vadd.f32 %v228_v14, %v938_v12  ;;  %v196_v48 = vpop.f32.mrf.mxu2  ;;  %v503_v14 = vld [vmem:[%s1057_s5 + $0x68] sm:$0xff] }
  0xb5   :  { %v197_v52 = vadd.f32 %v196_v48, %v926_v55  ;;  %512 = vmatpush.msrb.mxu0 %v503_v14 }
  0xb6   :  { %v277_v17 = vmax.f32 %v229_v15, 0.0 }
  0xb7   :  { %v298_v56 = vmax.f32 %v197_v52, 0.0 }
  0xb8   :  { %372 = vmatmul.f32.gmra.mxu2 %v284_v16  ;;  %425 = vmatmul.f32.vlgmr.msrb.gmra.mxu3 %v277_v17  ;;  %v502_v16 = vld [vmem:[%s1057_s5 + $0x60] sm:$0xff]  ;;  %v501_v17 = vld [vmem:[%s1057_s5 + $0x58] sm:$0xff] }
  0xb9   :  { %513 = vmatpush.msrb.mxu0 %v502_v16 }
  0xbb   :  { %v231_v19 = vpop.f32.mrf.mxu1  ;;  %514 = vmatpush.msrb.mxu0 %v501_v17 }
  0xbc   :  { %v232_v20 = vadd.f32 %v231_v19, %v938_v12  ;;  %v199_v57 = vpop.f32.mrf.mxu2  ;;  %v209_v19 = vadd.f32 %v208_v18, %v926_v55 }
  0xbd   :  { %v200_v59 = vadd.f32 %v199_v57, %v926_v55 }
  0xbe   :  { %v279_v22 = vmax.f32 %v232_v20, 0.0  ;;  %v500_v20 = vld [vmem:[%s1057_s5 + $0x50] sm:$0xff]  ;;  %v306_v23 = vmax.f32 %v209_v19, 0.0 }
  0xbf   :  { %v300_v62 = vmax.f32 %v200_v59, 0.0  ;;  %515 = vmatpush.msrb.mxu0 %v500_v20 }
  0xc0   :  { %375 = vmatmul.f32.gmra.mxu2 %v286_v21  ;;  %428 = vmatmul.f32.gmra.mxu3 %v279_v22 }
  0xc3   :  { %v234_v24 = vpop.f32.mrf.mxu1 }
  0xc4   :  { %v235_v25 = vadd.f32 %v234_v24, %v938_v12  ;;  %v202_v0 = vpop.f32.mrf.mxu2  ;;  %v499_v24 = vld [vmem:[%s1057_s5 + $0x48] sm:$0xff] }
  0xc5   :  { %v203_v1 = vadd.f32 %v202_v0, %v926_v55  ;;  %516 = vmatpush.msrb.mxu0 %v499_v24  ;;  %v497_v55 = vld [vmem:[%s1057_s5 + $0x38] sm:$0xff] }
  0xc6   :  { %v281_v27 = vmax.f32 %v235_v25, 0.0 }
  0xc7   :  { %v302_v4 = vmax.f32 %v203_v1, 0.0 }
  0xc8   :  { %378 = vmatmul.f32.gmra.mxu2 %v288_v26  ;;  %431 = vmatmul.f32.gmra.mxu3 %v281_v27  ;;  %v498_v26 = vld [vmem:[%s1057_s5 + $0x40] sm:$0xff]  ;;  %v496_v27 = vld [vmem:[%s1057_s5 + $0x30] sm:$0xff] }
  0xc9   :  { %517 = vmatpush.msrb.mxu0 %v498_v26 }
  0xcb   :  { %v237_v30 = vpop.f32.mrf.mxu1  ;;  %518 = vmatpush.msrb.mxu0 %v497_v55 }
  0xcc   :  { %v238_v31 = vadd.f32 %v237_v30, %v938_v12  ;;  %v495_v30 = vld [vmem:[%s1057_s5 + $0x28] sm:$0xff] }
  0xcd   :  { %519 = vmatpush.msrb.mxu0 %v496_v27 }
  0xce   :  { %v283_v33 = vmax.f32 %v238_v31, 0.0  ;;  %v494_v31 = vld [vmem:[%s1057_s5 + $0x20] sm:$0xff] }
  0xcf   :  { %520 = vmatpush.msrb.mxu0 %v495_v30 }
  0xd0   :  { %381 = vmatmul.f32.gmra.mxu2 %v290_v32  ;;  %434 = vmatmul.f32.gmra.mxu3 %v283_v33  ;;  %v493_v33 = vld [vmem:[%s1057_s5 + $0x18] sm:$0xff] }
  0xd1   :  { %521 = vmatpush.msrb.mxu0 %v494_v31 }
  0xd3   :  { %v240_v36 = vpop.f32.mrf.mxu1  ;;  %522 = vmatpush.msrb.mxu0 %v493_v33 }
  0xd4   :  { %v241_v37 = vadd.f32 %v240_v36, %v938_v12 }
  0xd5   :  { %523 = vmatpush.msrb.mxu0 %v492_v34 }
  0xd6   :  { %v285_v39 = vmax.f32 %v241_v37, 0.0 }
  0xd8   :  { %437 = vmatmul.f32.gmra.mxu3 %v285_v39  ;;  %384 = vmatmul.f32.gmra.mxu2 %v292_v38  ;;  %v491_v38 = vld [vmem:[%s1057_s5 + $0x8] sm:$0xff] }
  0xd9   :  { %524 = vmatpush.msrb.mxu0 %v491_v38 }
  0xdb   :  { %v243_v42 = vpop.f32.mrf.mxu1  ;;  %525 = vmatpush.msrb.mxu0 %v490_v40 }
  0xdc   :  { %v244_v43 = vadd.f32 %v243_v42, %v938_v12 }
  0xde   :  { %v287_v45 = vmax.f32 %v244_v43, 0.0 }
  0xe0   :  { %440 = vmatmul.f32.gmra.mxu3 %v287_v45  ;;  %387 = vmatmul.f32.gmra.mxu2 %v294_v44 }
  0xe3   :  { %v246_v47 = vpop.f32.mrf.mxu1 }
  0xe4   :  { %v247_v49 = vadd.f32 %v246_v47, %v938_v12 }
  0xe6   :  { %v289_v51 = vmax.f32 %v247_v49, 0.0  ;;  %v1019_v49 = vld [vmem:[%s1056_s4] ss:$0 sm:$0xff] }
  0xe8   :  { %443 = vmatmul.f32.gmra.mxu3 %v289_v51  ;;  %390 = vmatmul.f32.gmra.mxu2 %v296_v50 }
  0xeb   :  { %v249_v53 = vpop.f32.mrf.mxu1 }
  0xec   :  { %v250_v54 = vadd.f32 %v249_v53, %v938_v12 }
  0xee   :  { %v291_v58 = vmax.f32 %v250_v54, 0.0 }
  0xf0   :  { %446 = vmatmul.f32.gmra.mxu3 %v291_v58  ;;  %393 = vmatmul.f32.gmra.mxu2 %v298_v56 }
  0xf3   :  { %v252_v60 = vpop.f32.mrf.mxu1 }
  0xf4   :  { %v253_v61 = vadd.f32 %v252_v60, %v938_v12 }
  0xf6   :  { %v293_v63 = vmax.f32 %v253_v61, 0.0 }
  0xf8   :  { %449 = vmatmul.f32.gmra.mxu3 %v293_v63  ;;  %396 = vmatmul.f32.gmra.mxu2 %v300_v62 }
  0xfb   :  { %v255_v2 = vpop.f32.mrf.mxu1 }
  0xfc   :  { %v256_v3 = vadd.f32 %v255_v2, %v938_v12 }
  0xfe   :  { %v295_v5 = vmax.f32 %v256_v3, 0.0 }
 0x100   :  { %452 = vmatmul.f32.gmra.mxu3 %v295_v5  ;;  %399 = vmatmul.f32.gmra.mxu2 %v302_v4 }
 0x103   :  { %v258_v10 = vpop.f32.mrf.mxu1 }
 0x104   :  { %v259_v11 = vadd.f32 %v258_v10, %v938_v12 }
 0x106   :  { %v297_v15 = vmax.f32 %v259_v11, 0.0 }
 0x108   :  { %455 = vmatmul.f32.gmra.mxu3 %v297_v15  ;;  %402 = vmatmul.f32.gmra.mxu2 %v304_v13 }
 0x10b   :  { %v261_v21 = vpop.f32.mrf.mxu1 }
 0x10c   :  { %v262_v22 = vadd.f32 %v261_v21, %v938_v12 }
 0x10e   :  { %v299_v25 = vmax.f32 %v262_v22, 0.0 }
 0x110   :  { %458 = vmatmul.f32.gmra.mxu3 %v299_v25  ;;  %405 = vmatmul.f32.gmra.mxu2 %v306_v23 }
 0x113   :  { %v264_v28 = vpop.f32.mrf.mxu1 }
 0x114   :  { %v265_v29 = vadd.f32 %v264_v28, %v938_v12 }
 0x116   :  { %v301_v32 = vmax.f32 %v265_v29, 0.0 }
 0x118   :  { %461 = vmatmul.f32.gmra.mxu3 %v301_v32 }
 0x11b   :  { %v267_v35 = vpop.f32.mrf.mxu1  ;;  %v361_v36 = vpop.f32.mrf.mxu2 }
 0x11c   :  { %v268_v37 = vadd.f32 %v267_v35, %v938_v12  ;;  %v362_v51 = vadd.f32 %v1019_v49, %v361_v36 }
 0x11e   :  { %v303_v39 = vmax.f32 %v268_v37, 0.0 }
 0x120   :  { %464 = vmatmul.f32.gmra.mxu3 %v303_v39 }
 0x123   :  { %v270_v41 = vpop.f32.mrf.mxu1  ;;  %v364_v42 = vpop.f32.mrf.mxu2 }
 0x124   :  { %v271_v43 = vadd.f32 %v270_v41, %v938_v12  ;;  %v365_v56 = vadd.f32 %v1019_v49, %v364_v42 }
 0x126   :  { %v305_v44 = vmax.f32 %v271_v43, 0.0 }
 0x128   :  { %467 = vmatmul.f32.gmra.mxu3 %v305_v44 }
 0x12b   :  { %v273_v45 = vpop.f32.mrf.mxu1  ;;  %v367_v47 = vpop.f32.mrf.mxu2 }
 0x12c   :  { %v274_v46 = vadd.f32 %v273_v45, %v938_v12  ;;  %v368_v60 = vadd.f32 %v1019_v49, %v367_v47 }
 0x12e   :  { %v307_v48 = vmax.f32 %v274_v46, 0.0 }
 0x130   :  { %470 = vmatmul.f32.gmra.mxu3 %v307_v48 }
 0x133   :  { %v370_v50 = vpop.f32.mrf.mxu2 }
 0x134   :  { %v371_v1 = vadd.f32 %v1019_v49, %v370_v50 }
 0x13b   :  { %v426_v52 = vpop.f32.mrf.mxu3  ;;  %v373_v57 = vpop.f32.mrf.mxu2 }
 0x13c   :  { %v427_v53 = vadd.f32 %v426_v52, %v362_v51  ;;  %v374_v6 = vadd.f32 %v1019_v49, %v373_v57 }
 0x13e   :  { %v474_v54 = vmax.f32 %v427_v53, 0.0 }
 0x140   :  { %526 = vmatmul.f32.vlgmr.msrb.gmra.mxu0 %v474_v54 }
 0x143   :  { %v429_v58 = vpop.f32.mrf.mxu3  ;;  %v376_v61 = vpop.f32.mrf.mxu2 }
 0x144   :  { %v430_v12 = vadd.f32 %v429_v58, %v365_v56  ;;  %v377_v11 = vadd.f32 %v1019_v49, %v376_v61 }
 0x146   :  { %v475_v59 = vmax.f32 %v430_v12, 0.0 }
 0x148   :  { %529 = vmatmul.f32.gmra.mxu0 %v475_v59 }
 0x14b   :  { %v432_v62 = vpop.f32.mrf.mxu3  ;;  %v379_v4 = vpop.f32.mrf.mxu2 }
 0x14c   :  { %v433_v63 = vadd.f32 %v432_v62, %v368_v60  ;;  %v380_v17 = vadd.f32 %v1019_v49, %v379_v4 }
 0x14e   :  { %v476_v0 = vmax.f32 %v433_v63, 0.0 }
 0x150   :  { %532 = vmatmul.f32.gmra.mxu0 %v476_v0 }
 0x153   :  { %v435_v2 = vpop.f32.mrf.mxu3  ;;  %v382_v10 = vpop.f32.mrf.mxu2 }
 0x154   :  { %v436_v3 = vadd.f32 %v435_v2, %v371_v1  ;;  %v383_v22 = vadd.f32 %v1019_v49, %v382_v10 }
 0x156   :  { %v477_v5 = vmax.f32 %v436_v3, 0.0 }
 0x158   :  { %535 = vmatmul.f32.gmra.mxu0 %v477_v5 }
 0x15b   :  { %v438_v7 = vpop.f32.mrf.mxu3  ;;  %v385_v16 = vpop.f32.mrf.mxu2 }
 0x15c   :  { %v439_v8 = vadd.f32 %v438_v7, %v374_v6  ;;  %v386_v26 = vadd.f32 %v1019_v49, %v385_v16 }
 0x15e   :  { %v478_v9 = vmax.f32 %v439_v8, 0.0 }
 0x160   :  { %538 = vmatmul.f32.gmra.mxu0 %v478_v9 }
 0x163   :  { %v441_v13 = vpop.f32.mrf.mxu3  ;;  %v388_v21 = vpop.f32.mrf.mxu2 }
 0x164   :  { %v442_v14 = vadd.f32 %v441_v13, %v377_v11  ;;  %v389_v30 = vadd.f32 %v1019_v49, %v388_v21 }
 0x166   :  { %v479_v15 = vmax.f32 %v442_v14, 0.0 }
 0x168   :  { %541 = vmatmul.f32.gmra.mxu0 %v479_v15  ;;  %v694_v15 = vld [vmem:[%s1058_s6] ss:$0 sm:$0xff] }
 0x16b   :  { %v444_v18 = vpop.f32.mrf.mxu3  ;;  %v391_v27 = vpop.f32.mrf.mxu2 }
 0x16c   :  { %v445_v19 = vadd.f32 %v444_v18, %v380_v17  ;;  %v392_v35 = vadd.f32 %v1019_v49, %v391_v27 }
 0x16e   :  { %v480_v20 = vmax.f32 %v445_v19, 0.0 }
 0x170   :  { %544 = vmatmul.f32.gmra.mxu0 %v480_v20 }
 0x173   :  { %v447_v23 = vpop.f32.mrf.mxu3  ;;  %v394_v33 = vpop.f32.mrf.mxu2 }
 0x174   :  { %v448_v24 = vadd.f32 %v447_v23, %v383_v22  ;;  %v395_v40 = vadd.f32 %v1019_v49, %v394_v33 }
 0x176   :  { %v481_v25 = vmax.f32 %v448_v24, 0.0 }
 0x178   :  { %547 = vmatmul.f32.gmra.mxu0 %v481_v25 }
 0x17b   :  { %v450_v55 = vpop.f32.mrf.mxu3  ;;  %v397_v39 = vpop.f32.mrf.mxu2 }
 0x17c   :  { %v451_v28 = vadd.f32 %v450_v55, %v386_v26  ;;  %v398_v44 = vadd.f32 %v1019_v49, %v397_v39 }
 0x17e   :  { %v482_v29 = vmax.f32 %v451_v28, 0.0 }
 0x180   :  { %550 = vmatmul.f32.gmra.mxu0 %v482_v29 }
 0x183   :  { %v453_v31 = vpop.f32.mrf.mxu3  ;;  %v400_v45 = vpop.f32.mrf.mxu2 }
 0x184   :  { %v454_v32 = vadd.f32 %v453_v31, %v389_v30  ;;  %v401_v50 = vadd.f32 %v1019_v49, %v400_v45 }
 0x186   :  { %v483_v34 = vmax.f32 %v454_v32, 0.0 }
 0x188   :  { %553 = vmatmul.f32.gmra.mxu0 %v483_v34 }
 0x18b   :  { %v456_v36 = vpop.f32.mrf.mxu3  ;;  %v403_v52 = vpop.f32.mrf.mxu2 }
 0x18c   :  { %v457_v37 = vadd.f32 %v456_v36, %v392_v35  ;;  %v404_v56 = vadd.f32 %v1019_v49, %v403_v52  ;;  %v592_v35 = vld [vmem:[%s1060_s8] sm:$0xff]  ;;  %v779_v36 = vmov 0  }
 0x18d   :  { %692 = vset.pattern.permute.xlu0 %v779_v36 }
 0x18e   :  { %v484_v38 = vmax.f32 %v457_v37, 0.0  ;;  %595 = vperm.xlu0 %692, %v592_v35  }
 0x190   :  { %556 = vmatmul.f32.gmra.mxu0 %v484_v38 }
 0x193   :  { %v459_v41 = vpop.f32.mrf.mxu3  ;;  %v406_v12 = vpop.f32.mrf.mxu2 }
 0x194   :  { %v460_v42 = vadd.f32 %v459_v41, %v395_v40  ;;  %v407_v60 = vadd.f32 %v1019_v49, %v406_v12 }
 0x196   :  { %v485_v43 = vmax.f32 %v460_v42, 0.0 }
 0x198   :  { %559 = vmatmul.f32.gmra.mxu0 %v485_v43 }
 0x19b   :  { %v462_v46 = vpop.f32.mrf.mxu3 }
 0x19c   :  { %v463_v47 = vadd.f32 %v462_v46, %v398_v44 }
 0x19e   :  { %v486_v48 = vmax.f32 %v463_v47, 0.0 }
 0x1a0   :  { %562 = vmatmul.f32.gmra.mxu0 %v486_v48 }
 0x1a3   :  { %v465_v51 = vpop.f32.mrf.mxu3 }
 0x1a4   :  { %v466_v53 = vadd.f32 %v465_v51, %v401_v50  ;;  %v591_v51 = vld [vmem:[%s1059_s7] sm:$0xff] }
 0x1a6   :  { %v487_v54 = vmax.f32 %v466_v53, 0.0 }
 0x1a8   :  { %565 = vmatmul.f32.gmra.mxu0 %v487_v54 }
 0x1ab   :  { %v468_v57 = vpop.f32.mrf.mxu3 }
 0x1ac   :  { %v469_v58 = vadd.f32 %v468_v57, %v404_v56 }
 0x1ae   :  { %v488_v59 = vmax.f32 %v469_v58, 0.0 }
 0x1b0   :  { %568 = vmatmul.f32.gmra.mxu0 %v488_v59 }
 0x1b3   :  { %v471_v61 = vpop.f32.mrf.mxu3 }
 0x1b4   :  { %v472_v62 = vadd.f32 %v471_v61, %v407_v60 }
 0x1b6   :  { %v489_v63 = vmax.f32 %v472_v62, 0.0 }
 0x1b8   :  { %571 = vmatmul.f32.gmra.mxu0 %v489_v63 }
 0x1bd   :  { %v1037_v0 = vpop.f32.mrf.mxu0 }
 0x1be   :  { %v528_v47 = vadd.f32 %v694_v15, %v1037_v0 }
 0x1c0   :  { %v575_v50 = vmax.f32 %v528_v47, 0.0 }
 0x1c5   :  { %v530_v1 = vpop.f32.mrf.mxu0 }
 0x1c6   :  { %v531_v45 = vadd.f32 %v694_v15, %v530_v1 }
 0x1c8   :  { %v576_v48 = vmax.f32 %v531_v45, 0.0 }
 0x1cd   :  { %v533_v2 = vpop.f32.mrf.mxu0 }
 0x1ce   :  { %v534_v43 = vadd.f32 %v694_v15, %v533_v2 }
 0x1d0   :  { %v577_v46 = vmax.f32 %v534_v43, 0.0 }
 0x1d5   :  { %v536_v3 = vpop.f32.mrf.mxu0 }
 0x1d6   :  { %v537_v41 = vadd.f32 %v694_v15, %v536_v3 }
 0x1d8   :  { %v578_v44 = vmax.f32 %v537_v41, 0.0 }
 0x1dd   :  { %v539_v4 = vpop.f32.mrf.mxu0 }
 0x1de   :  { %v540_v39 = vadd.f32 %v694_v15, %v539_v4 }
 0x1e0   :  { %v579_v42 = vmax.f32 %v540_v39, 0.0 }
 0x1e5   :  { %v542_v5 = vpop.f32.mrf.mxu0 }
 0x1e6   :  { %v543_v37 = vadd.f32 %v694_v15, %v542_v5 }
 0x1e8   :  { %v580_v40 = vmax.f32 %v543_v37, 0.0 }
 0x1ed   :  { %v545_v6 = vpop.f32.mrf.mxu0 }
 0x1ee   :  { %v546_v33 = vadd.f32 %v694_v15, %v545_v6 }
 0x1f0   :  { %v581_v38 = vmax.f32 %v546_v33, 0.0 }
 0x1f5   :  { %v548_v7 = vpop.f32.mrf.mxu0 }
 0x1f6   :  { %v549_v31 = vadd.f32 %v694_v15, %v548_v7 }
 0x1f8   :  { %v582_v34 = vmax.f32 %v549_v31, 0.0 }
 0x1fd   :  { %v551_v8 = vpop.f32.mrf.mxu0 }
 0x1fe   :  { %v552_v29 = vadd.f32 %v694_v15, %v551_v8 }
 0x200   :  { %v583_v32 = vmax.f32 %v552_v29, 0.0  ;;  %v596_v52 = vpop.permute.xlu0 %595 }
 0x205   :  { %v554_v9 = vpop.f32.mrf.mxu0 }
 0x206   :  { %v555_v27 = vadd.f32 %v694_v15, %v554_v9 }
 0x208   :  { %v584_v30 = vmax.f32 %v555_v27, 0.0 }
 0x20d   :  { %v557_v10 = vpop.f32.mrf.mxu0 }
 0x20e   :  { %v558_v26 = vadd.f32 %v694_v15, %v557_v10 }
 0x210   :  { %v585_v28 = vmax.f32 %v558_v26, 0.0 }
 0x215   :  { %v560_v11 = vpop.f32.mrf.mxu0 }
 0x216   :  { %v561_v24 = vadd.f32 %v694_v15, %v560_v11 }
 0x218   :  { %v586_v55 = vmax.f32 %v561_v24, 0.0 }
 0x21d   :  { %v563_v13 = vpop.f32.mrf.mxu0 }
 0x21e   :  { %v564_v22 = vadd.f32 %v694_v15, %v563_v13 }
 0x220   :  { %v587_v25 = vmax.f32 %v564_v22, 0.0 }
 0x225   :  { %v566_v14 = vpop.f32.mrf.mxu0 }
 0x226   :  { %v567_v20 = vadd.f32 %v694_v15, %v566_v14 }
 0x228   :  { %v588_v23 = vmax.f32 %v567_v20, 0.0 }
 0x22d   :  { %v569_v49 = vpop.f32.mrf.mxu0 }
 0x22e   :  { %v570_v18 = vadd.f32 %v694_v15, %v569_v49 }
 0x230   :  { %v589_v21 = vmax.f32 %v570_v18, 0.0 }
 0x235   :  { %v572_v16 = vpop.f32.mrf.mxu0 }
 0x236   :  { %v573_v17 = vadd.f32 %v694_v15, %v572_v16 }
 0x238   :  { %v590_v19 = vmax.f32 %v573_v17, 0.0 }
 0x23a   :  { %598 = vmatpush.xpose.msra.mxu1 %v590_v19 }
 0x23e   :  { %599 = vmatpush.xpose.msra.mxu1 %v589_v21 }
 0x242   :  { %600 = vmatpush.xpose.msra.mxu1 %v588_v23 }
 0x246   :  { %601 = vmatpush.xpose.msra.mxu1 %v587_v25 }
 0x24a   :  { %602 = vmatpush.xpose.msra.mxu1 %v586_v55 }
 0x24e   :  { %603 = vmatpush.xpose.msra.mxu1 %v585_v28 }
 0x252   :  { %604 = vmatpush.xpose.msra.mxu1 %v584_v30 }
 0x256   :  { %605 = vmatpush.xpose.msra.mxu1 %v583_v32 }
 0x25a   :  { %606 = vmatpush.xpose.msra.mxu1 %v582_v34 }
 0x25e   :  { %607 = vmatpush.xpose.msra.mxu1 %v581_v38 }
 0x262   :  { %608 = vmatpush.xpose.msra.mxu1 %v580_v40 }
 0x266   :  { %609 = vmatpush.xpose.msra.mxu1 %v579_v42 }
 0x26a   :  { %610 = vmatpush.xpose.msra.mxu1 %v578_v44 }
 0x26e   :  { %611 = vmatpush.xpose.msra.mxu1 %v577_v46 }
 0x272   :  { %612 = vmatpush.xpose.msra.mxu1 %v576_v48 }
 0x276   :  { %613 = vmatpush.xpose.msra.mxu1 %v575_v50 }
 0x279   :  { %614 = vmatmul.f32.vlgmr.msra.gmra.mxu1 %v591_v51 }
 0x2f6   :  { %v615_v53 = vpop.f32.mrf.mxu1 }
 0x2f7   :  { %v616_v54 = vadd.f32 %v615_v53, %v596_v52 }
 0x2f9   :  { %618 = vst [vmem:[#allocation7] sm:$0xff] %v616_v54 }
 0x2fa   :  { %629 = dma.vmem_to_hbm [thread:$0]  %s625_s21, 128, %s627_s3, [#allocation4]  }
 0x2fb   :  { %771 = dma.done.wait [#allocation4], 128  }
 0x2fc   :  { %772 = vsyncadd [#allocation4], 4294967168 }
 0x2fd   :  { %634 = vsyncpa [#allocation3], 1 }
 0x2fe   :  { %635 = vsyncpa [#allocation6], 1 }
 0x2ff   :  { %636 = vsyncpa [#allocation4], 1 }

</bundles_post_ra>
